<compile_context>
chip_gen: v7x
topology: tpu7x:2x2x1
jax: 0.10.0
libtpu: 0.0.40
codegen_flags: <defaults>
</compile_context>

<pallas_src>
import functools

import jax
import jax.numpy as jnp
from jax.experimental import pallas as pl
from jax.experimental.pallas import tpu as pltpu

_LANES = 128


def _mlp_kernel(x_ref, w1_ref, b1_ref, w2_ref, b2_ref, o_ref, *, hidden):
    # x_ref/o_ref: (tr, 128) f32 tiles, batch on lanes.
    # w1_ref/b1_ref/w2_ref: (H,) f32 in SMEM; b2_ref: (1,) f32 in SMEM.
    x = x_ref[...]
    acc = jnp.zeros(x.shape, dtype=jnp.float32)
    # out = sum_h w2[h] * sigmoid(w1[h]*x + b1[h]) + b2   (VPU muls/adds + EUP exp)
    for h in range(hidden):                      # static unroll, H is small
        a = jax.nn.sigmoid(w1_ref[h] * x + b1_ref[h])
        acc = acc + w2_ref[h] * a
    o_ref[...] = (acc + b2_ref[0]).astype(o_ref.dtype)


def function_approximator_forward(x, w1, b1, w2, b2, *, rows_per_block=8):
    """x: (B, 1). w1: (H, 1), b1: (H,), w2: (1, H), b2: (1,). Returns (B, 1)."""
    B = x.shape[0]
    H = w1.shape[0]

    # Lane-dense reshape of the batch: pad B up to a whole number of row-blocks.
    R = -(-B // _LANES)                          # rows of 128 samples
    tr = min(rows_per_block, R)                  # rows per grid step
    R_pad = -(-R // tr) * tr
    B_pad = R_pad * _LANES

    xf = x.reshape(B).astype(jnp.float32)
    xf = jnp.pad(xf, (0, B_pad - B))
    x2d = xf.reshape(R_pad, _LANES)

    w1f = w1.reshape(H).astype(jnp.float32)
    b1f = b1.reshape(H).astype(jnp.float32)
    w2f = w2.reshape(H).astype(jnp.float32)
    b2f = b2.reshape(1).astype(jnp.float32)

    grid = (R_pad // tr,)
    kernel = functools.partial(_mlp_kernel, hidden=H)

    out2d = pl.pallas_call(
        kernel,
        out_shape=jax.ShapeDtypeStruct((R_pad, _LANES), jnp.float32),
        grid=grid,
        in_specs=[
            pl.BlockSpec((tr, _LANES), lambda i: (i, 0)),              # x tiles
            pl.BlockSpec(memory_space=pltpu.MemorySpace.SMEM),         # w1
            pl.BlockSpec(memory_space=pltpu.MemorySpace.SMEM),         # b1
            pl.BlockSpec(memory_space=pltpu.MemorySpace.SMEM),         # w2
            pl.BlockSpec(memory_space=pltpu.MemorySpace.SMEM),         # b2
        ],
        out_specs=pl.BlockSpec((tr, _LANES), lambda i: (i, 0)),
        compiler_params=pltpu.CompilerParams(
            dimension_semantics=("parallel",)),
    )(x2d, w1f, b1f, w2f, b2f)

    out = out2d.reshape(B_pad)[:B].reshape(B, 1).astype(x.dtype)
    return out


if __name__ == "__main__":
    # Synthetic deterministic parameters (PyTorch default init: U(-1/sqrt(fan_in), +1/sqrt(fan_in)))
    HIDDEN = 32      # args.hidden_nodes
    B = 300          # batch of 1-D samples (deliberately not a multiple of 128)

    key = jax.random.PRNGKey(0)
    kx, k1, k2, k3, k4 = jax.random.split(key, 5)

    x = jax.random.normal(kx, (B, 1), dtype=jnp.float32)

    bound1 = 1.0 / jnp.sqrt(1.0)             # fan_in = 1
    w1 = jax.random.uniform(k1, (HIDDEN, 1), minval=-bound1, maxval=bound1, dtype=jnp.float32)
    b1 = jax.random.uniform(k2, (HIDDEN,), minval=-bound1, maxval=bound1, dtype=jnp.float32)

    bound2 = 1.0 / jnp.sqrt(float(HIDDEN))   # fan_in = HIDDEN
    w2 = jax.random.uniform(k3, (1, HIDDEN), minval=-bound2, maxval=bound2, dtype=jnp.float32)
    b2 = jax.random.uniform(k4, (1,), minval=-bound2, maxval=bound2, dtype=jnp.float32)

    out = function_approximator_forward(x, w1, b1, w2, b2)
    out = jax.block_until_ready(out)

    # Pure-JAX reference check of forward semantics
    ref = jax.nn.sigmoid(x @ w1.T + b1) @ w2.T + b2
    assert out.shape == (B, 1)
    assert jnp.allclose(out, ref, atol=1e-5, rtol=1e-5)

    print("KERNEL_OK")
</pallas_src>

<mosaic_0001>
module attributes {stable_mosaic.version = 11 : i64} {
  func.func @_mlp_kernel(%arg0: i32, %arg1: memref<3x128xf32, #tpu.memory_space<vmem>>, %arg2: memref<32xf32, #tpu.memory_space<smem>>, %arg3: memref<32xf32, #tpu.memory_space<smem>>, %arg4: memref<32xf32, #tpu.memory_space<smem>>, %arg5: memref<1xf32, #tpu.memory_space<smem>>, %arg6: memref<3x128xf32, #tpu.memory_space<vmem>>) attributes {dimension_semantics = [#tpu.dimension_semantics<parallel>], iteration_bounds = array<i64: 1>, scalar_prefetch = 0 : i64, scratch_operands = 0 : i64, tpu.core_type = #tpu.core_type<tc>, window_params = [{transform_indices = @transform_0, window_bounds = array<i64: 3, 128>}, {transform_indices = @transform_1, window_bounds = array<i64: 32>}, {transform_indices = @transform_2, window_bounds = array<i64: 32>}, {transform_indices = @transform_3, window_bounds = array<i64: 32>}, {transform_indices = @transform_4, window_bounds = array<i64: 1>}, {transform_indices = @transform_5, window_bounds = array<i64: 3, 128>}]} {
    %c0 = arith.constant 0 : index
    %c0_0 = arith.constant 0 : index
    %0 = vector.load %arg1[%c0, %c0_0] : memref<3x128xf32, #tpu.memory_space<vmem>>, vector<3x128xf32>
    %cst = arith.constant 0.000000e+00 : f32
    %1 = vector.broadcast %cst : f32 to vector<3x128xf32>
    %c0_1 = arith.constant 0 : index
    %2 = memref.load %arg2[%c0_1] : memref<32xf32, #tpu.memory_space<smem>>
    %3 = vector.broadcast %2 : f32 to vector<3x128xf32>
    %4 = arith.mulf %3, %0 : vector<3x128xf32>
    %c0_2 = arith.constant 0 : index
    %5 = memref.load %arg3[%c0_2] : memref<32xf32, #tpu.memory_space<smem>>
    %6 = vector.broadcast %5 : f32 to vector<3x128xf32>
    %7 = arith.addf %4, %6 : vector<3x128xf32>
    %8 = arith.negf %7 : vector<3x128xf32>
    %9 = math.exp %8 : vector<3x128xf32>
    %cst_3 = arith.constant 1.000000e+00 : f32
    %10 = vector.broadcast %cst_3 : f32 to vector<3x128xf32>
    %11 = arith.addf %10, %9 : vector<3x128xf32>
    %12 = arith.divf %10, %11 : vector<3x128xf32>
    %c0_4 = arith.constant 0 : index
    %13 = memref.load %arg4[%c0_4] : memref<32xf32, #tpu.memory_space<smem>>
    %14 = vector.broadcast %13 : f32 to vector<3x128xf32>
    %15 = arith.mulf %14, %12 : vector<3x128xf32>
    %16 = arith.addf %1, %15 : vector<3x128xf32>
    %c1 = arith.constant 1 : index
    %17 = memref.load %arg2[%c1] : memref<32xf32, #tpu.memory_space<smem>>
    %18 = vector.broadcast %17 : f32 to vector<3x128xf32>
    %19 = arith.mulf %18, %0 : vector<3x128xf32>
    %c1_5 = arith.constant 1 : index
    %20 = memref.load %arg3[%c1_5] : memref<32xf32, #tpu.memory_space<smem>>
    %21 = vector.broadcast %20 : f32 to vector<3x128xf32>
    %22 = arith.addf %19, %21 : vector<3x128xf32>
    %23 = arith.negf %22 : vector<3x128xf32>
    %24 = math.exp %23 : vector<3x128xf32>
    %cst_6 = arith.constant 1.000000e+00 : f32
    %25 = vector.broadcast %cst_6 : f32 to vector<3x128xf32>
    %26 = arith.addf %25, %24 : vector<3x128xf32>
    %27 = arith.divf %25, %26 : vector<3x128xf32>
    %c1_7 = arith.constant 1 : index
    %28 = memref.load %arg4[%c1_7] : memref<32xf32, #tpu.memory_space<smem>>
    %29 = vector.broadcast %28 : f32 to vector<3x128xf32>
    %30 = arith.mulf %29, %27 : vector<3x128xf32>
    %31 = arith.addf %16, %30 : vector<3x128xf32>
    %c2 = arith.constant 2 : index
    %32 = memref.load %arg2[%c2] : memref<32xf32, #tpu.memory_space<smem>>
    %33 = vector.broadcast %32 : f32 to vector<3x128xf32>
    %34 = arith.mulf %33, %0 : vector<3x128xf32>
    %c2_8 = arith.constant 2 : index
    %35 = memref.load %arg3[%c2_8] : memref<32xf32, #tpu.memory_space<smem>>
    %36 = vector.broadcast %35 : f32 to vector<3x128xf32>
    %37 = arith.addf %34, %36 : vector<3x128xf32>
    %38 = arith.negf %37 : vector<3x128xf32>
    %39 = math.exp %38 : vector<3x128xf32>
    %cst_9 = arith.constant 1.000000e+00 : f32
    %40 = vector.broadcast %cst_9 : f32 to vector<3x128xf32>
    %41 = arith.addf %40, %39 : vector<3x128xf32>
    %42 = arith.divf %40, %41 : vector<3x128xf32>
    %c2_10 = arith.constant 2 : index
    %43 = memref.load %arg4[%c2_10] : memref<32xf32, #tpu.memory_space<smem>>
    %44 = vector.broadcast %43 : f32 to vector<3x128xf32>
    %45 = arith.mulf %44, %42 : vector<3x128xf32>
    %46 = arith.addf %31, %45 : vector<3x128xf32>
    %c3 = arith.constant 3 : index
    %47 = memref.load %arg2[%c3] : memref<32xf32, #tpu.memory_space<smem>>
    %48 = vector.broadcast %47 : f32 to vector<3x128xf32>
    %49 = arith.mulf %48, %0 : vector<3x128xf32>
    %c3_11 = arith.constant 3 : index
    %50 = memref.load %arg3[%c3_11] : memref<32xf32, #tpu.memory_space<smem>>
    %51 = vector.broadcast %50 : f32 to vector<3x128xf32>
    %52 = arith.addf %49, %51 : vector<3x128xf32>
    %53 = arith.negf %52 : vector<3x128xf32>
    %54 = math.exp %53 : vector<3x128xf32>
    %cst_12 = arith.constant 1.000000e+00 : f32
    %55 = vector.broadcast %cst_12 : f32 to vector<3x128xf32>
    %56 = arith.addf %55, %54 : vector<3x128xf32>
    %57 = arith.divf %55, %56 : vector<3x128xf32>
    %c3_13 = arith.constant 3 : index
    %58 = memref.load %arg4[%c3_13] : memref<32xf32, #tpu.memory_space<smem>>
    %59 = vector.broadcast %58 : f32 to vector<3x128xf32>
    %60 = arith.mulf %59, %57 : vector<3x128xf32>
    %61 = arith.addf %46, %60 : vector<3x128xf32>
    %c4 = arith.constant 4 : index
    %62 = memref.load %arg2[%c4] : memref<32xf32, #tpu.memory_space<smem>>
    %63 = vector.broadcast %62 : f32 to vector<3x128xf32>
    %64 = arith.mulf %63, %0 : vector<3x128xf32>
    %c4_14 = arith.constant 4 : index
    %65 = memref.load %arg3[%c4_14] : memref<32xf32, #tpu.memory_space<smem>>
    %66 = vector.broadcast %65 : f32 to vector<3x128xf32>
    %67 = arith.addf %64, %66 : vector<3x128xf32>
    %68 = arith.negf %67 : vector<3x128xf32>
    %69 = math.exp %68 : vector<3x128xf32>
    %cst_15 = arith.constant 1.000000e+00 : f32
    %70 = vector.broadcast %cst_15 : f32 to vector<3x128xf32>
    %71 = arith.addf %70, %69 : vector<3x128xf32>
    %72 = arith.divf %70, %71 : vector<3x128xf32>
    %c4_16 = arith.constant 4 : index
    %73 = memref.load %arg4[%c4_16] : memref<32xf32, #tpu.memory_space<smem>>
    %74 = vector.broadcast %73 : f32 to vector<3x128xf32>
    %75 = arith.mulf %74, %72 : vector<3x128xf32>
    %76 = arith.addf %61, %75 : vector<3x128xf32>
    %c5 = arith.constant 5 : index
    %77 = memref.load %arg2[%c5] : memref<32xf32, #tpu.memory_space<smem>>
    %78 = vector.broadcast %77 : f32 to vector<3x128xf32>
    %79 = arith.mulf %78, %0 : vector<3x128xf32>
    %c5_17 = arith.constant 5 : index
    %80 = memref.load %arg3[%c5_17] : memref<32xf32, #tpu.memory_space<smem>>
    %81 = vector.broadcast %80 : f32 to vector<3x128xf32>
    %82 = arith.addf %79, %81 : vector<3x128xf32>
    %83 = arith.negf %82 : vector<3x128xf32>
    %84 = math.exp %83 : vector<3x128xf32>
    %cst_18 = arith.constant 1.000000e+00 : f32
    %85 = vector.broadcast %cst_18 : f32 to vector<3x128xf32>
    %86 = arith.addf %85, %84 : vector<3x128xf32>
    %87 = arith.divf %85, %86 : vector<3x128xf32>
    %c5_19 = arith.constant 5 : index
    %88 = memref.load %arg4[%c5_19] : memref<32xf32, #tpu.memory_space<smem>>
    %89 = vector.broadcast %88 : f32 to vector<3x128xf32>
    %90 = arith.mulf %89, %87 : vector<3x128xf32>
    %91 = arith.addf %76, %90 : vector<3x128xf32>
    %c6 = arith.constant 6 : index
    %92 = memref.load %arg2[%c6] : memref<32xf32, #tpu.memory_space<smem>>
    %93 = vector.broadcast %92 : f32 to vector<3x128xf32>
    %94 = arith.mulf %93, %0 : vector<3x128xf32>
    %c6_20 = arith.constant 6 : index
    %95 = memref.load %arg3[%c6_20] : memref<32xf32, #tpu.memory_space<smem>>
    %96 = vector.broadcast %95 : f32 to vector<3x128xf32>
    %97 = arith.addf %94, %96 : vector<3x128xf32>
    %98 = arith.negf %97 : vector<3x128xf32>
    %99 = math.exp %98 : vector<3x128xf32>
    %cst_21 = arith.constant 1.000000e+00 : f32
    %100 = vector.broadcast %cst_21 : f32 to vector<3x128xf32>
    %101 = arith.addf %100, %99 : vector<3x128xf32>
    %102 = arith.divf %100, %101 : vector<3x128xf32>
    %c6_22 = arith.constant 6 : index
    %103 = memref.load %arg4[%c6_22] : memref<32xf32, #tpu.memory_space<smem>>
    %104 = vector.broadcast %103 : f32 to vector<3x128xf32>
    %105 = arith.mulf %104, %102 : vector<3x128xf32>
    %106 = arith.addf %91, %105 : vector<3x128xf32>
    %c7 = arith.constant 7 : index
    %107 = memref.load %arg2[%c7] : memref<32xf32, #tpu.memory_space<smem>>
    %108 = vector.broadcast %107 : f32 to vector<3x128xf32>
    %109 = arith.mulf %108, %0 : vector<3x128xf32>
    %c7_23 = arith.constant 7 : index
    %110 = memref.load %arg3[%c7_23] : memref<32xf32, #tpu.memory_space<smem>>
    %111 = vector.broadcast %110 : f32 to vector<3x128xf32>
    %112 = arith.addf %109, %111 : vector<3x128xf32>
    %113 = arith.negf %112 : vector<3x128xf32>
    %114 = math.exp %113 : vector<3x128xf32>
    %cst_24 = arith.constant 1.000000e+00 : f32
    %115 = vector.broadcast %cst_24 : f32 to vector<3x128xf32>
    %116 = arith.addf %115, %114 : vector<3x128xf32>
    %117 = arith.divf %115, %116 : vector<3x128xf32>
    %c7_25 = arith.constant 7 : index
    %118 = memref.load %arg4[%c7_25] : memref<32xf32, #tpu.memory_space<smem>>
    %119 = vector.broadcast %118 : f32 to vector<3x128xf32>
    %120 = arith.mulf %119, %117 : vector<3x128xf32>
    %121 = arith.addf %106, %120 : vector<3x128xf32>
    %c8 = arith.constant 8 : index
    %122 = memref.load %arg2[%c8] : memref<32xf32, #tpu.memory_space<smem>>
    %123 = vector.broadcast %122 : f32 to vector<3x128xf32>
    %124 = arith.mulf %123, %0 : vector<3x128xf32>
    %c8_26 = arith.constant 8 : index
    %125 = memref.load %arg3[%c8_26] : memref<32xf32, #tpu.memory_space<smem>>
    %126 = vector.broadcast %125 : f32 to vector<3x128xf32>
    %127 = arith.addf %124, %126 : vector<3x128xf32>
    %128 = arith.negf %127 : vector<3x128xf32>
    %129 = math.exp %128 : vector<3x128xf32>
    %cst_27 = arith.constant 1.000000e+00 : f32
    %130 = vector.broadcast %cst_27 : f32 to vector<3x128xf32>
    %131 = arith.addf %130, %129 : vector<3x128xf32>
    %132 = arith.divf %130, %131 : vector<3x128xf32>
    %c8_28 = arith.constant 8 : index
    %133 = memref.load %arg4[%c8_28] : memref<32xf32, #tpu.memory_space<smem>>
    %134 = vector.broadcast %133 : f32 to vector<3x128xf32>
    %135 = arith.mulf %134, %132 : vector<3x128xf32>
    %136 = arith.addf %121, %135 : vector<3x128xf32>
    %c9 = arith.constant 9 : index
    %137 = memref.load %arg2[%c9] : memref<32xf32, #tpu.memory_space<smem>>
    %138 = vector.broadcast %137 : f32 to vector<3x128xf32>
    %139 = arith.mulf %138, %0 : vector<3x128xf32>
    %c9_29 = arith.constant 9 : index
    %140 = memref.load %arg3[%c9_29] : memref<32xf32, #tpu.memory_space<smem>>
    %141 = vector.broadcast %140 : f32 to vector<3x128xf32>
    %142 = arith.addf %139, %141 : vector<3x128xf32>
    %143 = arith.negf %142 : vector<3x128xf32>
    %144 = math.exp %143 : vector<3x128xf32>
    %cst_30 = arith.constant 1.000000e+00 : f32
    %145 = vector.broadcast %cst_30 : f32 to vector<3x128xf32>
    %146 = arith.addf %145, %144 : vector<3x128xf32>
    %147 = arith.divf %145, %146 : vector<3x128xf32>
    %c9_31 = arith.constant 9 : index
    %148 = memref.load %arg4[%c9_31] : memref<32xf32, #tpu.memory_space<smem>>
    %149 = vector.broadcast %148 : f32 to vector<3x128xf32>
    %150 = arith.mulf %149, %147 : vector<3x128xf32>
    %151 = arith.addf %136, %150 : vector<3x128xf32>
    %c10 = arith.constant 10 : index
    %152 = memref.load %arg2[%c10] : memref<32xf32, #tpu.memory_space<smem>>
    %153 = vector.broadcast %152 : f32 to vector<3x128xf32>
    %154 = arith.mulf %153, %0 : vector<3x128xf32>
    %c10_32 = arith.constant 10 : index
    %155 = memref.load %arg3[%c10_32] : memref<32xf32, #tpu.memory_space<smem>>
    %156 = vector.broadcast %155 : f32 to vector<3x128xf32>
    %157 = arith.addf %154, %156 : vector<3x128xf32>
    %158 = arith.negf %157 : vector<3x128xf32>
    %159 = math.exp %158 : vector<3x128xf32>
    %cst_33 = arith.constant 1.000000e+00 : f32
    %160 = vector.broadcast %cst_33 : f32 to vector<3x128xf32>
    %161 = arith.addf %160, %159 : vector<3x128xf32>
    %162 = arith.divf %160, %161 : vector<3x128xf32>
    %c10_34 = arith.constant 10 : index
    %163 = memref.load %arg4[%c10_34] : memref<32xf32, #tpu.memory_space<smem>>
    %164 = vector.broadcast %163 : f32 to vector<3x128xf32>
    %165 = arith.mulf %164, %162 : vector<3x128xf32>
    %166 = arith.addf %151, %165 : vector<3x128xf32>
    %c11 = arith.constant 11 : index
    %167 = memref.load %arg2[%c11] : memref<32xf32, #tpu.memory_space<smem>>
    %168 = vector.broadcast %167 : f32 to vector<3x128xf32>
    %169 = arith.mulf %168, %0 : vector<3x128xf32>
    %c11_35 = arith.constant 11 : index
    %170 = memref.load %arg3[%c11_35] : memref<32xf32, #tpu.memory_space<smem>>
    %171 = vector.broadcast %170 : f32 to vector<3x128xf32>
    %172 = arith.addf %169, %171 : vector<3x128xf32>
    %173 = arith.negf %172 : vector<3x128xf32>
    %174 = math.exp %173 : vector<3x128xf32>
    %cst_36 = arith.constant 1.000000e+00 : f32
    %175 = vector.broadcast %cst_36 : f32 to vector<3x128xf32>
    %176 = arith.addf %175, %174 : vector<3x128xf32>
    %177 = arith.divf %175, %176 : vector<3x128xf32>
    %c11_37 = arith.constant 11 : index
    %178 = memref.load %arg4[%c11_37] : memref<32xf32, #tpu.memory_space<smem>>
    %179 = vector.broadcast %178 : f32 to vector<3x128xf32>
    %180 = arith.mulf %179, %177 : vector<3x128xf32>
    %181 = arith.addf %166, %180 : vector<3x128xf32>
    %c12 = arith.constant 12 : index
    %182 = memref.load %arg2[%c12] : memref<32xf32, #tpu.memory_space<smem>>
    %183 = vector.broadcast %182 : f32 to vector<3x128xf32>
    %184 = arith.mulf %183, %0 : vector<3x128xf32>
    %c12_38 = arith.constant 12 : index
    %185 = memref.load %arg3[%c12_38] : memref<32xf32, #tpu.memory_space<smem>>
    %186 = vector.broadcast %185 : f32 to vector<3x128xf32>
    %187 = arith.addf %184, %186 : vector<3x128xf32>
    %188 = arith.negf %187 : vector<3x128xf32>
    %189 = math.exp %188 : vector<3x128xf32>
    %cst_39 = arith.constant 1.000000e+00 : f32
    %190 = vector.broadcast %cst_39 : f32 to vector<3x128xf32>
    %191 = arith.addf %190, %189 : vector<3x128xf32>
    %192 = arith.divf %190, %191 : vector<3x128xf32>
    %c12_40 = arith.constant 12 : index
    %193 = memref.load %arg4[%c12_40] : memref<32xf32, #tpu.memory_space<smem>>
    %194 = vector.broadcast %193 : f32 to vector<3x128xf32>
    %195 = arith.mulf %194, %192 : vector<3x128xf32>
    %196 = arith.addf %181, %195 : vector<3x128xf32>
    %c13 = arith.constant 13 : index
    %197 = memref.load %arg2[%c13] : memref<32xf32, #tpu.memory_space<smem>>
    %198 = vector.broadcast %197 : f32 to vector<3x128xf32>
    %199 = arith.mulf %198, %0 : vector<3x128xf32>
    %c13_41 = arith.constant 13 : index
    %200 = memref.load %arg3[%c13_41] : memref<32xf32, #tpu.memory_space<smem>>
    %201 = vector.broadcast %200 : f32 to vector<3x128xf32>
    %202 = arith.addf %199, %201 : vector<3x128xf32>
    %203 = arith.negf %202 : vector<3x128xf32>
    %204 = math.exp %203 : vector<3x128xf32>
    %cst_42 = arith.constant 1.000000e+00 : f32
    %205 = vector.broadcast %cst_42 : f32 to vector<3x128xf32>
    %206 = arith.addf %205, %204 : vector<3x128xf32>
    %207 = arith.divf %205, %206 : vector<3x128xf32>
    %c13_43 = arith.constant 13 : index
    %208 = memref.load %arg4[%c13_43] : memref<32xf32, #tpu.memory_space<smem>>
    %209 = vector.broadcast %208 : f32 to vector<3x128xf32>
    %210 = arith.mulf %209, %207 : vector<3x128xf32>
    %211 = arith.addf %196, %210 : vector<3x128xf32>
    %c14 = arith.constant 14 : index
    %212 = memref.load %arg2[%c14] : memref<32xf32, #tpu.memory_space<smem>>
    %213 = vector.broadcast %212 : f32 to vector<3x128xf32>
    %214 = arith.mulf %213, %0 : vector<3x128xf32>
    %c14_44 = arith.constant 14 : index
    %215 = memref.load %arg3[%c14_44] : memref<32xf32, #tpu.memory_space<smem>>
    %216 = vector.broadcast %215 : f32 to vector<3x128xf32>
    %217 = arith.addf %214, %216 : vector<3x128xf32>
    %218 = arith.negf %217 : vector<3x128xf32>
    %219 = math.exp %218 : vector<3x128xf32>
    %cst_45 = arith.constant 1.000000e+00 : f32
    %220 = vector.broadcast %cst_45 : f32 to vector<3x128xf32>
    %221 = arith.addf %220, %219 : vector<3x128xf32>
    %222 = arith.divf %220, %221 : vector<3x128xf32>
    %c14_46 = arith.constant 14 : index
    %223 = memref.load %arg4[%c14_46] : memref<32xf32, #tpu.memory_space<smem>>
    %224 = vector.broadcast %223 : f32 to vector<3x128xf32>
    %225 = arith.mulf %224, %222 : vector<3x128xf32>
    %226 = arith.addf %211, %225 : vector<3x128xf32>
    %c15 = arith.constant 15 : index
    %227 = memref.load %arg2[%c15] : memref<32xf32, #tpu.memory_space<smem>>
    %228 = vector.broadcast %227 : f32 to vector<3x128xf32>
    %229 = arith.mulf %228, %0 : vector<3x128xf32>
    %c15_47 = arith.constant 15 : index
    %230 = memref.load %arg3[%c15_47] : memref<32xf32, #tpu.memory_space<smem>>
    %231 = vector.broadcast %230 : f32 to vector<3x128xf32>
    %232 = arith.addf %229, %231 : vector<3x128xf32>
    %233 = arith.negf %232 : vector<3x128xf32>
    %234 = math.exp %233 : vector<3x128xf32>
    %cst_48 = arith.constant 1.000000e+00 : f32
    %235 = vector.broadcast %cst_48 : f32 to vector<3x128xf32>
    %236 = arith.addf %235, %234 : vector<3x128xf32>
    %237 = arith.divf %235, %236 : vector<3x128xf32>
    %c15_49 = arith.constant 15 : index
    %238 = memref.load %arg4[%c15_49] : memref<32xf32, #tpu.memory_space<smem>>
    %239 = vector.broadcast %238 : f32 to vector<3x128xf32>
    %240 = arith.mulf %239, %237 : vector<3x128xf32>
    %241 = arith.addf %226, %240 : vector<3x128xf32>
    %c16 = arith.constant 16 : index
    %242 = memref.load %arg2[%c16] : memref<32xf32, #tpu.memory_space<smem>>
    %243 = vector.broadcast %242 : f32 to vector<3x128xf32>
    %244 = arith.mulf %243, %0 : vector<3x128xf32>
    %c16_50 = arith.constant 16 : index
    %245 = memref.load %arg3[%c16_50] : memref<32xf32, #tpu.memory_space<smem>>
    %246 = vector.broadcast %245 : f32 to vector<3x128xf32>
    %247 = arith.addf %244, %246 : vector<3x128xf32>
    %248 = arith.negf %247 : vector<3x128xf32>
    %249 = math.exp %248 : vector<3x128xf32>
    %cst_51 = arith.constant 1.000000e+00 : f32
    %250 = vector.broadcast %cst_51 : f32 to vector<3x128xf32>
    %251 = arith.addf %250, %249 : vector<3x128xf32>
    %252 = arith.divf %250, %251 : vector<3x128xf32>
    %c16_52 = arith.constant 16 : index
    %253 = memref.load %arg4[%c16_52] : memref<32xf32, #tpu.memory_space<smem>>
    %254 = vector.broadcast %253 : f32 to vector<3x128xf32>
    %255 = arith.mulf %254, %252 : vector<3x128xf32>
    %256 = arith.addf %241, %255 : vector<3x128xf32>
    %c17 = arith.constant 17 : index
    %257 = memref.load %arg2[%c17] : memref<32xf32, #tpu.memory_space<smem>>
    %258 = vector.broadcast %257 : f32 to vector<3x128xf32>
    %259 = arith.mulf %258, %0 : vector<3x128xf32>
    %c17_53 = arith.constant 17 : index
    %260 = memref.load %arg3[%c17_53] : memref<32xf32, #tpu.memory_space<smem>>
    %261 = vector.broadcast %260 : f32 to vector<3x128xf32>
    %262 = arith.addf %259, %261 : vector<3x128xf32>
    %263 = arith.negf %262 : vector<3x128xf32>
    %264 = math.exp %263 : vector<3x128xf32>
    %cst_54 = arith.constant 1.000000e+00 : f32
    %265 = vector.broadcast %cst_54 : f32 to vector<3x128xf32>
    %266 = arith.addf %265, %264 : vector<3x128xf32>
    %267 = arith.divf %265, %266 : vector<3x128xf32>
    %c17_55 = arith.constant 17 : index
    %268 = memref.load %arg4[%c17_55] : memref<32xf32, #tpu.memory_space<smem>>
    %269 = vector.broadcast %268 : f32 to vector<3x128xf32>
    %270 = arith.mulf %269, %267 : vector<3x128xf32>
    %271 = arith.addf %256, %270 : vector<3x128xf32>
    %c18 = arith.constant 18 : index
    %272 = memref.load %arg2[%c18] : memref<32xf32, #tpu.memory_space<smem>>
    %273 = vector.broadcast %272 : f32 to vector<3x128xf32>
    %274 = arith.mulf %273, %0 : vector<3x128xf32>
    %c18_56 = arith.constant 18 : index
    %275 = memref.load %arg3[%c18_56] : memref<32xf32, #tpu.memory_space<smem>>
    %276 = vector.broadcast %275 : f32 to vector<3x128xf32>
    %277 = arith.addf %274, %276 : vector<3x128xf32>
    %278 = arith.negf %277 : vector<3x128xf32>
    %279 = math.exp %278 : vector<3x128xf32>
    %cst_57 = arith.constant 1.000000e+00 : f32
    %280 = vector.broadcast %cst_57 : f32 to vector<3x128xf32>
    %281 = arith.addf %280, %279 : vector<3x128xf32>
    %282 = arith.divf %280, %281 : vector<3x128xf32>
    %c18_58 = arith.constant 18 : index
    %283 = memref.load %arg4[%c18_58] : memref<32xf32, #tpu.memory_space<smem>>
    %284 = vector.broadcast %283 : f32 to vector<3x128xf32>
    %285 = arith.mulf %284, %282 : vector<3x128xf32>
    %286 = arith.addf %271, %285 : vector<3x128xf32>
    %c19 = arith.constant 19 : index
    %287 = memref.load %arg2[%c19] : memref<32xf32, #tpu.memory_space<smem>>
    %288 = vector.broadcast %287 : f32 to vector<3x128xf32>
    %289 = arith.mulf %288, %0 : vector<3x128xf32>
    %c19_59 = arith.constant 19 : index
    %290 = memref.load %arg3[%c19_59] : memref<32xf32, #tpu.memory_space<smem>>
    %291 = vector.broadcast %290 : f32 to vector<3x128xf32>
    %292 = arith.addf %289, %291 : vector<3x128xf32>
    %293 = arith.negf %292 : vector<3x128xf32>
    %294 = math.exp %293 : vector<3x128xf32>
    %cst_60 = arith.constant 1.000000e+00 : f32
    %295 = vector.broadcast %cst_60 : f32 to vector<3x128xf32>
    %296 = arith.addf %295, %294 : vector<3x128xf32>
    %297 = arith.divf %295, %296 : vector<3x128xf32>
    %c19_61 = arith.constant 19 : index
    %298 = memref.load %arg4[%c19_61] : memref<32xf32, #tpu.memory_space<smem>>
    %299 = vector.broadcast %298 : f32 to vector<3x128xf32>
    %300 = arith.mulf %299, %297 : vector<3x128xf32>
    %301 = arith.addf %286, %300 : vector<3x128xf32>
    %c20 = arith.constant 20 : index
    %302 = memref.load %arg2[%c20] : memref<32xf32, #tpu.memory_space<smem>>
    %303 = vector.broadcast %302 : f32 to vector<3x128xf32>
    %304 = arith.mulf %303, %0 : vector<3x128xf32>
    %c20_62 = arith.constant 20 : index
    %305 = memref.load %arg3[%c20_62] : memref<32xf32, #tpu.memory_space<smem>>
    %306 = vector.broadcast %305 : f32 to vector<3x128xf32>
    %307 = arith.addf %304, %306 : vector<3x128xf32>
    %308 = arith.negf %307 : vector<3x128xf32>
    %309 = math.exp %308 : vector<3x128xf32>
    %cst_63 = arith.constant 1.000000e+00 : f32
    %310 = vector.broadcast %cst_63 : f32 to vector<3x128xf32>
    %311 = arith.addf %310, %309 : vector<3x128xf32>
    %312 = arith.divf %310, %311 : vector<3x128xf32>
    %c20_64 = arith.constant 20 : index
    %313 = memref.load %arg4[%c20_64] : memref<32xf32, #tpu.memory_space<smem>>
    %314 = vector.broadcast %313 : f32 to vector<3x128xf32>
    %315 = arith.mulf %314, %312 : vector<3x128xf32>
    %316 = arith.addf %301, %315 : vector<3x128xf32>
    %c21 = arith.constant 21 : index
    %317 = memref.load %arg2[%c21] : memref<32xf32, #tpu.memory_space<smem>>
    %318 = vector.broadcast %317 : f32 to vector<3x128xf32>
    %319 = arith.mulf %318, %0 : vector<3x128xf32>
    %c21_65 = arith.constant 21 : index
    %320 = memref.load %arg3[%c21_65] : memref<32xf32, #tpu.memory_space<smem>>
    %321 = vector.broadcast %320 : f32 to vector<3x128xf32>
    %322 = arith.addf %319, %321 : vector<3x128xf32>
    %323 = arith.negf %322 : vector<3x128xf32>
    %324 = math.exp %323 : vector<3x128xf32>
    %cst_66 = arith.constant 1.000000e+00 : f32
    %325 = vector.broadcast %cst_66 : f32 to vector<3x128xf32>
    %326 = arith.addf %325, %324 : vector<3x128xf32>
    %327 = arith.divf %325, %326 : vector<3x128xf32>
    %c21_67 = arith.constant 21 : index
    %328 = memref.load %arg4[%c21_67] : memref<32xf32, #tpu.memory_space<smem>>
    %329 = vector.broadcast %328 : f32 to vector<3x128xf32>
    %330 = arith.mulf %329, %327 : vector<3x128xf32>
    %331 = arith.addf %316, %330 : vector<3x128xf32>
    %c22 = arith.constant 22 : index
    %332 = memref.load %arg2[%c22] : memref<32xf32, #tpu.memory_space<smem>>
    %333 = vector.broadcast %332 : f32 to vector<3x128xf32>
    %334 = arith.mulf %333, %0 : vector<3x128xf32>
    %c22_68 = arith.constant 22 : index
    %335 = memref.load %arg3[%c22_68] : memref<32xf32, #tpu.memory_space<smem>>
    %336 = vector.broadcast %335 : f32 to vector<3x128xf32>
    %337 = arith.addf %334, %336 : vector<3x128xf32>
    %338 = arith.negf %337 : vector<3x128xf32>
    %339 = math.exp %338 : vector<3x128xf32>
    %cst_69 = arith.constant 1.000000e+00 : f32
    %340 = vector.broadcast %cst_69 : f32 to vector<3x128xf32>
    %341 = arith.addf %340, %339 : vector<3x128xf32>
    %342 = arith.divf %340, %341 : vector<3x128xf32>
    %c22_70 = arith.constant 22 : index
    %343 = memref.load %arg4[%c22_70] : memref<32xf32, #tpu.memory_space<smem>>
    %344 = vector.broadcast %343 : f32 to vector<3x128xf32>
    %345 = arith.mulf %344, %342 : vector<3x128xf32>
    %346 = arith.addf %331, %345 : vector<3x128xf32>
    %c23 = arith.constant 23 : index
    %347 = memref.load %arg2[%c23] : memref<32xf32, #tpu.memory_space<smem>>
    %348 = vector.broadcast %347 : f32 to vector<3x128xf32>
    %349 = arith.mulf %348, %0 : vector<3x128xf32>
    %c23_71 = arith.constant 23 : index
    %350 = memref.load %arg3[%c23_71] : memref<32xf32, #tpu.memory_space<smem>>
    %351 = vector.broadcast %350 : f32 to vector<3x128xf32>
    %352 = arith.addf %349, %351 : vector<3x128xf32>
    %353 = arith.negf %352 : vector<3x128xf32>
    %354 = math.exp %353 : vector<3x128xf32>
    %cst_72 = arith.constant 1.000000e+00 : f32
    %355 = vector.broadcast %cst_72 : f32 to vector<3x128xf32>
    %356 = arith.addf %355, %354 : vector<3x128xf32>
    %357 = arith.divf %355, %356 : vector<3x128xf32>
    %c23_73 = arith.constant 23 : index
    %358 = memref.load %arg4[%c23_73] : memref<32xf32, #tpu.memory_space<smem>>
    %359 = vector.broadcast %358 : f32 to vector<3x128xf32>
    %360 = arith.mulf %359, %357 : vector<3x128xf32>
    %361 = arith.addf %346, %360 : vector<3x128xf32>
    %c24 = arith.constant 24 : index
    %362 = memref.load %arg2[%c24] : memref<32xf32, #tpu.memory_space<smem>>
    %363 = vector.broadcast %362 : f32 to vector<3x128xf32>
    %364 = arith.mulf %363, %0 : vector<3x128xf32>
    %c24_74 = arith.constant 24 : index
    %365 = memref.load %arg3[%c24_74] : memref<32xf32, #tpu.memory_space<smem>>
    %366 = vector.broadcast %365 : f32 to vector<3x128xf32>
    %367 = arith.addf %364, %366 : vector<3x128xf32>
    %368 = arith.negf %367 : vector<3x128xf32>
    %369 = math.exp %368 : vector<3x128xf32>
    %cst_75 = arith.constant 1.000000e+00 : f32
    %370 = vector.broadcast %cst_75 : f32 to vector<3x128xf32>
    %371 = arith.addf %370, %369 : vector<3x128xf32>
    %372 = arith.divf %370, %371 : vector<3x128xf32>
    %c24_76 = arith.constant 24 : index
    %373 = memref.load %arg4[%c24_76] : memref<32xf32, #tpu.memory_space<smem>>
    %374 = vector.broadcast %373 : f32 to vector<3x128xf32>
    %375 = arith.mulf %374, %372 : vector<3x128xf32>
    %376 = arith.addf %361, %375 : vector<3x128xf32>
    %c25 = arith.constant 25 : index
    %377 = memref.load %arg2[%c25] : memref<32xf32, #tpu.memory_space<smem>>
    %378 = vector.broadcast %377 : f32 to vector<3x128xf32>
    %379 = arith.mulf %378, %0 : vector<3x128xf32>
    %c25_77 = arith.constant 25 : index
    %380 = memref.load %arg3[%c25_77] : memref<32xf32, #tpu.memory_space<smem>>
    %381 = vector.broadcast %380 : f32 to vector<3x128xf32>
    %382 = arith.addf %379, %381 : vector<3x128xf32>
    %383 = arith.negf %382 : vector<3x128xf32>
    %384 = math.exp %383 : vector<3x128xf32>
    %cst_78 = arith.constant 1.000000e+00 : f32
    %385 = vector.broadcast %cst_78 : f32 to vector<3x128xf32>
    %386 = arith.addf %385, %384 : vector<3x128xf32>
    %387 = arith.divf %385, %386 : vector<3x128xf32>
    %c25_79 = arith.constant 25 : index
    %388 = memref.load %arg4[%c25_79] : memref<32xf32, #tpu.memory_space<smem>>
    %389 = vector.broadcast %388 : f32 to vector<3x128xf32>
    %390 = arith.mulf %389, %387 : vector<3x128xf32>
    %391 = arith.addf %376, %390 : vector<3x128xf32>
    %c26 = arith.constant 26 : index
    %392 = memref.load %arg2[%c26] : memref<32xf32, #tpu.memory_space<smem>>
    %393 = vector.broadcast %392 : f32 to vector<3x128xf32>
    %394 = arith.mulf %393, %0 : vector<3x128xf32>
    %c26_80 = arith.constant 26 : index
    %395 = memref.load %arg3[%c26_80] : memref<32xf32, #tpu.memory_space<smem>>
    %396 = vector.broadcast %395 : f32 to vector<3x128xf32>
    %397 = arith.addf %394, %396 : vector<3x128xf32>
    %398 = arith.negf %397 : vector<3x128xf32>
    %399 = math.exp %398 : vector<3x128xf32>
    %cst_81 = arith.constant 1.000000e+00 : f32
    %400 = vector.broadcast %cst_81 : f32 to vector<3x128xf32>
    %401 = arith.addf %400, %399 : vector<3x128xf32>
    %402 = arith.divf %400, %401 : vector<3x128xf32>
    %c26_82 = arith.constant 26 : index
    %403 = memref.load %arg4[%c26_82] : memref<32xf32, #tpu.memory_space<smem>>
    %404 = vector.broadcast %403 : f32 to vector<3x128xf32>
    %405 = arith.mulf %404, %402 : vector<3x128xf32>
    %406 = arith.addf %391, %405 : vector<3x128xf32>
    %c27 = arith.constant 27 : index
    %407 = memref.load %arg2[%c27] : memref<32xf32, #tpu.memory_space<smem>>
    %408 = vector.broadcast %407 : f32 to vector<3x128xf32>
    %409 = arith.mulf %408, %0 : vector<3x128xf32>
    %c27_83 = arith.constant 27 : index
    %410 = memref.load %arg3[%c27_83] : memref<32xf32, #tpu.memory_space<smem>>
    %411 = vector.broadcast %410 : f32 to vector<3x128xf32>
    %412 = arith.addf %409, %411 : vector<3x128xf32>
    %413 = arith.negf %412 : vector<3x128xf32>
    %414 = math.exp %413 : vector<3x128xf32>
    %cst_84 = arith.constant 1.000000e+00 : f32
    %415 = vector.broadcast %cst_84 : f32 to vector<3x128xf32>
    %416 = arith.addf %415, %414 : vector<3x128xf32>
    %417 = arith.divf %415, %416 : vector<3x128xf32>
    %c27_85 = arith.constant 27 : index
    %418 = memref.load %arg4[%c27_85] : memref<32xf32, #tpu.memory_space<smem>>
    %419 = vector.broadcast %418 : f32 to vector<3x128xf32>
    %420 = arith.mulf %419, %417 : vector<3x128xf32>
    %421 = arith.addf %406, %420 : vector<3x128xf32>
    %c28 = arith.constant 28 : index
    %422 = memref.load %arg2[%c28] : memref<32xf32, #tpu.memory_space<smem>>
    %423 = vector.broadcast %422 : f32 to vector<3x128xf32>
    %424 = arith.mulf %423, %0 : vector<3x128xf32>
    %c28_86 = arith.constant 28 : index
    %425 = memref.load %arg3[%c28_86] : memref<32xf32, #tpu.memory_space<smem>>
    %426 = vector.broadcast %425 : f32 to vector<3x128xf32>
    %427 = arith.addf %424, %426 : vector<3x128xf32>
    %428 = arith.negf %427 : vector<3x128xf32>
    %429 = math.exp %428 : vector<3x128xf32>
    %cst_87 = arith.constant 1.000000e+00 : f32
    %430 = vector.broadcast %cst_87 : f32 to vector<3x128xf32>
    %431 = arith.addf %430, %429 : vector<3x128xf32>
    %432 = arith.divf %430, %431 : vector<3x128xf32>
    %c28_88 = arith.constant 28 : index
    %433 = memref.load %arg4[%c28_88] : memref<32xf32, #tpu.memory_space<smem>>
    %434 = vector.broadcast %433 : f32 to vector<3x128xf32>
    %435 = arith.mulf %434, %432 : vector<3x128xf32>
    %436 = arith.addf %421, %435 : vector<3x128xf32>
    %c29 = arith.constant 29 : index
    %437 = memref.load %arg2[%c29] : memref<32xf32, #tpu.memory_space<smem>>
    %438 = vector.broadcast %437 : f32 to vector<3x128xf32>
    %439 = arith.mulf %438, %0 : vector<3x128xf32>
    %c29_89 = arith.constant 29 : index
    %440 = memref.load %arg3[%c29_89] : memref<32xf32, #tpu.memory_space<smem>>
    %441 = vector.broadcast %440 : f32 to vector<3x128xf32>
    %442 = arith.addf %439, %441 : vector<3x128xf32>
    %443 = arith.negf %442 : vector<3x128xf32>
    %444 = math.exp %443 : vector<3x128xf32>
    %cst_90 = arith.constant 1.000000e+00 : f32
    %445 = vector.broadcast %cst_90 : f32 to vector<3x128xf32>
    %446 = arith.addf %445, %444 : vector<3x128xf32>
    %447 = arith.divf %445, %446 : vector<3x128xf32>
    %c29_91 = arith.constant 29 : index
    %448 = memref.load %arg4[%c29_91] : memref<32xf32, #tpu.memory_space<smem>>
    %449 = vector.broadcast %448 : f32 to vector<3x128xf32>
    %450 = arith.mulf %449, %447 : vector<3x128xf32>
    %451 = arith.addf %436, %450 : vector<3x128xf32>
    %c30 = arith.constant 30 : index
    %452 = memref.load %arg2[%c30] : memref<32xf32, #tpu.memory_space<smem>>
    %453 = vector.broadcast %452 : f32 to vector<3x128xf32>
    %454 = arith.mulf %453, %0 : vector<3x128xf32>
    %c30_92 = arith.constant 30 : index
    %455 = memref.load %arg3[%c30_92] : memref<32xf32, #tpu.memory_space<smem>>
    %456 = vector.broadcast %455 : f32 to vector<3x128xf32>
    %457 = arith.addf %454, %456 : vector<3x128xf32>
    %458 = arith.negf %457 : vector<3x128xf32>
    %459 = math.exp %458 : vector<3x128xf32>
    %cst_93 = arith.constant 1.000000e+00 : f32
    %460 = vector.broadcast %cst_93 : f32 to vector<3x128xf32>
    %461 = arith.addf %460, %459 : vector<3x128xf32>
    %462 = arith.divf %460, %461 : vector<3x128xf32>
    %c30_94 = arith.constant 30 : index
    %463 = memref.load %arg4[%c30_94] : memref<32xf32, #tpu.memory_space<smem>>
    %464 = vector.broadcast %463 : f32 to vector<3x128xf32>
    %465 = arith.mulf %464, %462 : vector<3x128xf32>
    %466 = arith.addf %451, %465 : vector<3x128xf32>
    %c31 = arith.constant 31 : index
    %467 = memref.load %arg2[%c31] : memref<32xf32, #tpu.memory_space<smem>>
    %468 = vector.broadcast %467 : f32 to vector<3x128xf32>
    %469 = arith.mulf %468, %0 : vector<3x128xf32>
    %c31_95 = arith.constant 31 : index
    %470 = memref.load %arg3[%c31_95] : memref<32xf32, #tpu.memory_space<smem>>
    %471 = vector.broadcast %470 : f32 to vector<3x128xf32>
    %472 = arith.addf %469, %471 : vector<3x128xf32>
    %473 = arith.negf %472 : vector<3x128xf32>
    %474 = math.exp %473 : vector<3x128xf32>
    %cst_96 = arith.constant 1.000000e+00 : f32
    %475 = vector.broadcast %cst_96 : f32 to vector<3x128xf32>
    %476 = arith.addf %475, %474 : vector<3x128xf32>
    %477 = arith.divf %475, %476 : vector<3x128xf32>
    %c31_97 = arith.constant 31 : index
    %478 = memref.load %arg4[%c31_97] : memref<32xf32, #tpu.memory_space<smem>>
    %479 = vector.broadcast %478 : f32 to vector<3x128xf32>
    %480 = arith.mulf %479, %477 : vector<3x128xf32>
    %481 = arith.addf %466, %480 : vector<3x128xf32>
    %c0_98 = arith.constant 0 : index
    %482 = memref.load %arg5[%c0_98] : memref<1xf32, #tpu.memory_space<smem>>
    %483 = vector.broadcast %482 : f32 to vector<3x128xf32>
    %484 = arith.addf %481, %483 : vector<3x128xf32>
    %c0_99 = arith.constant 0 : index
    %c0_100 = arith.constant 0 : index
    %485 = vector.load %arg6[%c0_99, %c0_100] : memref<3x128xf32, #tpu.memory_space<vmem>>, vector<3x128xf32>
    tpu.vector_store %arg6[%c0_99, %c0_100], %484 {strides = array<i32>} : memref<3x128xf32, #tpu.memory_space<vmem>>, vector<3x128xf32>,
    return
  }
  func.func @transform_0(%arg0: i32) -> (i32, i32) {
    %c0_i32 = arith.constant 0 : i32
    %c0_i32_0 = arith.constant 0 : i32
    return %arg0, %c0_i32 : i32, i32
  }
  func.func @transform_1(%arg0: i32) -> i32 {
    %c0_i32 = arith.constant 0 : i32
    %c0_i32_0 = arith.constant 0 : i32
    return %c0_i32 : i32
  }
  func.func @transform_2(%arg0: i32) -> i32 {
    %c0_i32 = arith.constant 0 : i32
    %c0_i32_0 = arith.constant 0 : i32
    return %c0_i32 : i32
  }
  func.func @transform_3(%arg0: i32) -> i32 {
    %c0_i32 = arith.constant 0 : i32
    %c0_i32_0 = arith.constant 0 : i32
    return %c0_i32 : i32
  }
  func.func @transform_4(%arg0: i32) -> i32 {
    %c0_i32 = arith.constant 0 : i32
    %c0_i32_0 = arith.constant 0 : i32
    return %c0_i32 : i32
  }
  func.func @transform_5(%arg0: i32) -> (i32, i32) {
    %c0_i32 = arith.constant 0 : i32
    %c0_i32_0 = arith.constant 0 : i32
    return %arg0, %c0_i32 : i32, i32
  }
}

</mosaic_0001>

<bundles_post_ra>
// kernel: tpu_custom_call.1
= control target key start
LH: loop header
LB: loop body
LE: loop exit
PB: predicated region body
PF: predicated region fallthrough
CT: control target
= control target key end

     0   :  { %11 = vsyncpa [#allocation4], 0  ;;  %s1324_s0 = inlined_call_operand.hbm [shape: f32[3,128], index: 0, kind: input, shape index: {}]   ;;  %s1325_s1 = inlined_call_operand.vmem [shape: f32[32], index: 1, kind: input, shape index: {}]   ;;  %s1326_s2 = inlined_call_operand.vmem [shape: f32[32], index: 2, kind: input, shape index: {}]   ;;  %s1327_s3 = inlined_call_operand.vmem [shape: f32[32], index: 3, kind: input, shape index: {}]   ;;  %s1328_s4 = inlined_call_operand.<no memory space> [shape: f32[1], index: 4, kind: input, shape index: {}]   ;;  %s1329_s5 = inlined_call_operand.hbm [shape: f32[3,128], index: 5, kind: output, shape index: {}]  }
   0x1   :  { %12 = vsyncpa [#allocation6], 0 }
   0x2   :  { %13 = vsyncpa [#allocation9], 0  ;;  %s41_s20 = sshll.u32 %s1326_s2, 4  ;;  %s42_s20 = int_to_ptr.vmem [resolvable:$true] %s41_s20 }
   0x3   :  { %14 = vsyncpa [#allocation5], 0  ;;  %s862_s21 = scalar_lea.vmem %s42_s20, 16  ;;  %p867_p1 = scmp.lt.s32.totalorder %s42_s20, %s42_s20 }
   0x4   :  { %p863_p0 = scmp.ne.s32.totalorder %s42_s20, %s862_s21  ;;  %p868_p2 = scmp.lt.s32.totalorder %s862_s21, %s862_s21 }
   0x6   :  { %p869_p3 = por %p868_p2, %p867_p1 }
   0x8   :  { %p870_p4 = pnand %p869_p3, %p863_p0 }
   0xa   :  { %873 = shalt.err (!%p870_p4)
}
   0xb   :  { %s950_s22 = smov [#allocation8]   ;;  %s951_s23 = smov [#allocation3]  }
   0xc   :  { %44 = dma.vmem_to_smem %s42_s20, 16, %s950_s22, [#allocation9]  }
   0xd   :  { %s21_s24 = sshll.u32 %s951_s23, 4  ;;  %s31_s27 = sshll.u32 %s1325_s1, 4  ;;  %s22_s24 = int_to_ptr.vmem [resolvable:$true] %s21_s24  ;;  %s32_s27 = int_to_ptr.vmem [resolvable:$true] %s31_s27 }
   0xe   :  { %s874_s29 = scalar_lea.hbm %s1324_s0, 64 }
   0xf   :  { %p875_p5 = scmp.ne.s32.totalorder %s1324_s0, %s874_s29  ;;  %p878_p6 = scmp.lt.u32.totalorder %s874_s29, %s1324_s0 }
  0x11   :  { %p880_p7 = pnand %p878_p6, %p875_p5 }
  0x13   :  { %883 = shalt.err (!%p880_p7)
}
  0x14   :  { %s884_s9 = scalar_lea.vmem %s22_s24, 64  ;;  %p889_p9 = scmp.lt.s32.totalorder %s22_s24, %s22_s24 }
  0x15   :  { %p885_p8 = scmp.ne.s32.totalorder %s22_s24, %s884_s9  ;;  %p890_p10 = scmp.lt.s32.totalorder %s884_s9, %s884_s9 }
  0x17   :  { %p891_p11 = por %p890_p10, %p889_p9 }
  0x19   :  { %p892_p12 = pnand %p891_p11, %p885_p8 }
  0x1b   :  { %895 = shalt.err (!%p892_p12)
}
  0x1c   :  { %24 = dma.hbm_to_vmem [thread:$0]  %s1324_s0, 64, %s22_s24, [#allocation4]  }
  0x1d   :  { %s51_s13 = sshll.u32 %s1327_s3, 4  ;;  %s896_s14 = scalar_lea.vmem %s32_s27, 16  ;;  %s52_s13 = int_to_ptr.vmem [resolvable:$true] %s51_s13 }
  0x1e   :  { %p897_p13 = scmp.ne.s32.totalorder %s32_s27, %s896_s14  ;;  %p901_p0 = scmp.lt.s32.totalorder %s32_s27, %s32_s27 }
  0x1f   :  { %p902_p1 = scmp.lt.s32.totalorder %s896_s14, %s896_s14 }
  0x21   :  { %p903_p2 = por %p902_p1, %p901_p0 }
  0x23   :  { %p904_p3 = pnand %p903_p2, %p897_p13 }
  0x25   :  { %907 = shalt.err (!%p904_p3)
}
  0x26   :  { %s952_s15 = smov [#allocation7]   ;;  %s908_s16 = scalar_lea.vmem %s52_s13, 16 }
  0x27   :  { %34 = dma.vmem_to_smem %s32_s27, 16, %s952_s15, [#allocation6]  }
  0x28   :  { %p909_p4 = scmp.ne.s32.totalorder %s52_s13, %s908_s16  ;;  %p913_p5 = scmp.lt.s32.totalorder %s52_s13, %s52_s13 }
  0x29   :  { %p914_p6 = scmp.lt.s32.totalorder %s908_s16, %s908_s16 }
  0x2b   :  { %p915_p7 = por %p914_p6, %p913_p5 }
  0x2d   :  { %p916_p8 = pnand %p915_p7, %p909_p4 }
  0x2f   :  { %919 = shalt.err (!%p916_p8)
}
  0x30   :  { %s953_s0 = smov [#allocation10]  }
  0x31   :  { %54 = dma.vmem_to_smem %s52_s13, 16, %s953_s0, [#allocation9]  }
  0x32   :  { %942 = dma.done.wait [#allocation4], 64  }
  0x33   :  { %943 = vsyncadd [#allocation4], 4294967232 }
  0x34   :  { %944 = dma.done.wait [#allocation6], 16  }
  0x35   :  { %945 = vsyncadd [#allocation6], 4294967280 }
  0x36   :  { %946 = dma.done.wait [#allocation9], 32  }
  0x37   :  { %947 = vsyncadd [#allocation9], 4294967264 }
  0x38   :  { %69 = sfence }
  0x39   :  { %s71_s3 = sld [smem:[#allocation7]]  ;;  %s605_s18 = sld [smem:[#allocation7 + $0x1]]  ;;  %v1006_v0 = vld [vmem:[#allocation3] sm:$0x7] }
  0x3a   :  { %s74_s17 = sld [smem:[#allocation8]]  ;;  %s606_s19 = sld [smem:[#allocation8 + $0x1]] }
  0x3b   :  { %s609_s20 = sld [smem:[#allocation7 + $0x2]]  ;;  %s613_s22 = sld [smem:[#allocation7 + $0x3]] }
  0x3c   :  { %s610_s21 = sld [smem:[#allocation8 + $0x2]]  ;;  %s1008_s23 = sld [smem:[#allocation8 + $0x3]] }
  0x3d   :  { %s617_s24 = sld [smem:[#allocation7 + $0x4]]  ;;  %s1013_s26 = sld [smem:[#allocation7 + $0x5]] }
  0x3e   :  { %s1010_s25 = sld [smem:[#allocation8 + $0x4]]  ;;  %s1016_s27 = sld [smem:[#allocation8 + $0x5]] }
  0x3f   :  { %v72_v1 = vstv %s71_s3  ;;  %v88_v4 = vstv %s605_s18  ;;  %s1018_s2 = sld [smem:[#allocation7 + $0x6]]  ;;  %s1023_s29 = sld [smem:[#allocation7 + $0x7]] }
  0x40   :  { %v75_v2 = vstv %s74_s17  ;;  %v73_v3 = vmul.f32 %v72_v1, %v1006_v0  ;;  %v89_v5 = vmul.f32 %v88_v4, %v1006_v0  ;;  %v91_v6 = vstv %s606_s19  ;;  %s1020_s28 = sld [smem:[#allocation8 + $0x6]]  ;;  %s1025_s30 = sld [smem:[#allocation10]] }
  0x41   :  { %v104_v8 = vstv %s609_s20  ;;  %v120_v12 = vstv %s613_s22  ;;  %s1029_s6 = sld [smem:[#allocation8 + $0x7]]  ;;  %s1032_s7 = sld [smem:[#allocation7 + $0x8]] }
  0x42   :  { %v76_v7 = vadd.f32 %v75_v2, %v73_v3  ;;  %v107_v9 = vstv %s610_s21  ;;  %v92_v10 = vadd.f32 %v91_v6, %v89_v5  ;;  %v105_v11 = vmul.f32 %v104_v8, %v1006_v0  ;;  %s1034_s8 = sld [smem:[#allocation8 + $0x8]]  ;;  %s1037_s9 = sld [smem:[#allocation7 + $0x9]] }
  0x43   :  { %v121_v14 = vmul.f32 %v120_v12, %v1006_v0  ;;  %v123_v15 = vstv %s1008_s23  ;;  %v136_v18 = vstv %s617_s24  ;;  %s1039_s1 = sld [smem:[#allocation10 + $0x1]]  ;;  %v152_v23 = vstv %s1013_s26  ;;  %s1046_s11 = sld [smem:[#allocation7 + $0xa]] }
  0x44   :  { %v604_v13 = vmul.f32 -1.442695, %v76_v7  ;;  %v607_v16 = vmul.f32 -1.442695, %v92_v10  ;;  %v108_v17 = vadd.f32 %v107_v9, %v105_v11  ;;  %v139_v19 = vstv %s1010_s25  ;;  %s1043_s10 = sld [smem:[#allocation8 + $0x9]]  ;;  %s1048_s12 = sld [smem:[#allocation10 + $0x2]] }
  0x45   :  { %v124_v20 = vadd.f32 %v123_v15, %v121_v14  ;;  %v137_v21 = vmul.f32 %v136_v18, %v1006_v0  ;;  %v155_v24 = vstv %s1016_s27  ;;  %v153_v27 = vmul.f32 %v152_v23, %v1006_v0  ;;  %s1052_s13 = sld [smem:[#allocation8 + $0xa]]  ;;  %s1054_s14 = sld [smem:[#allocation10 + $0x3]] }
  0x46   :  { %734 = vpow2.f32 %v604_v13  ;;  %v611_v22 = vmul.f32 -1.442695, %v108_v17  ;;  %v168_v28 = vstv %s1018_s2  ;;  %v171_v29 = vstv %s1020_s28  ;;  %s1056_s15 = sld [smem:[#allocation10 + $0x4]]  ;;  %s1062_s16 = sld [smem:[#allocation7 + $0xb]] }
  0x47   :  { %736 = vpow2.f32 %v607_v16  ;;  %v615_v25 = vmul.f32 -1.442695, %v124_v20  ;;  %v140_v26 = vadd.f32 %v139_v19, %v137_v21  ;;  %v156_v31 = vadd.f32 %v155_v24, %v153_v27  ;;  %s1064_s0 = sld [smem:[#allocation8 + $0xb]]  ;;  %s1071_s3 = sld [smem:[#allocation7 + $0xc]] }
  0x48   :  { %738 = vpow2.f32 %v611_v22  ;;  %v169_v32 = vmul.f32 %v168_v28, %v1006_v0  ;;  %v184_v33 = vstv %s1023_s29  ;;  %v187_v34 = vstv %s1029_s6  ;;  %s1073_s17 = sld [smem:[#allocation8 + $0xc]]  ;;  %s1079_s18 = sld [smem:[#allocation7 + $0xd]] }
  0x49   :  { %740 = vpow2.f32 %v615_v25  ;;  %v619_v30 = vmul.f32 -1.442695, %v140_v26  ;;  %v200_v35 = vstv %s1032_s7  ;;  %v623_v36 = vmul.f32 -1.442695, %v156_v31  ;;  %s1081_s19 = sld [smem:[#allocation8 + $0xd]]  ;;  %s1088_s21 = sld [smem:[#allocation7 + $0xe]] }
  0x4a   :  { %v172_v37 = vadd.f32 %v171_v29, %v169_v32  ;;  %v185_v38 = vmul.f32 %v184_v33, %v1006_v0  ;;  %v84_v39 = vstv %s1025_s30  ;;  %v201_v40 = vmul.f32 %v200_v35, %v1006_v0  ;;  %s1083_s20 = sld [smem:[#allocation10 + $0x5]]  ;;  %s1092_s22 = sld [smem:[#allocation10 + $0x6]] }
  0x4b   :  { %742 = vpow2.f32 %v619_v30  ;;  %v203_v41 = vstv %s1034_s8  ;;  %v216_v42 = vstv %s1037_s9  ;;  %v100_v46 = vstv %s1039_s1  ;;  %s1096_s23 = sld [smem:[#allocation8 + $0xe]]  ;;  %s1099_s24 = sld [smem:[#allocation7 + $0xf]] }
  0x4c   :  { %744 = vpow2.f32 %v623_v36  ;;  %v627_v43 = vmul.f32 -1.442695, %v172_v37  ;;  %v188_v44 = vadd.f32 %v187_v34, %v185_v38  ;;  %v217_v45 = vmul.f32 %v216_v42, %v1006_v0  ;;  %s1103_s25 = sld [smem:[#allocation8 + $0xf]]  ;;  %s1110_s27 = sld [smem:[#allocation7 + $0x10]] }
  0x4d   :  { %v204_v47 = vadd.f32 %v203_v41, %v201_v40  ;;  %v219_v48 = vstv %s1043_s10  ;;  %v232_v49 = vstv %s1046_s11  ;;  %v116_v56 = vstv %s1048_s12  ;;  %s1105_s26 = sld [smem:[#allocation10 + $0x7]]  ;;  %s1113_s2 = sld [smem:[#allocation8 + $0x10]] }
  0x4e   :  { %746 = vpow2.f32 %v627_v43  ;;  %v631_v51 = vmul.f32 -1.442695, %v188_v44  ;;  %v220_v52 = vadd.f32 %v219_v48, %v217_v45  ;;  %v233_v53 = vmul.f32 %v232_v49, %v1006_v0  ;;  %s1117_s28 = sld [smem:[#allocation10 + $0x8]]  ;;  %s1122_s29 = sld [smem:[#allocation7 + $0x11]] }
  0x4f   :  { %v635_v57 = vmul.f32 -1.442695, %v204_v47  ;;  %v235_v58 = vstv %s1052_s13  ;;  %v132_v60 = vstv %s1054_s14  ;;  %v148_v63 = vstv %s1056_s15  ;;  %s1125_s6 = sld [smem:[#allocation8 + $0x11]]  ;;  %s1134_s8 = sld [smem:[#allocation7 + $0x12]] }
  0x50   :  { %v735_v50 = vpop.eup %734  ;;  %748 = vpow2.f32 %v631_v51  ;;  %v236_v61 = vadd.f32 %v235_v58, %v233_v53  ;;  %v248_v1 = vstv %s1062_s16  ;;  %v251_v2 = vstv %s1064_s0  ;;  %s1127_s7 = sld [smem:[#allocation10 + $0x9]]  ;;  %s1139_s9 = sld [smem:[#allocation10 + $0xa]] }
  0x51   :  { %v737_v54 = vpop.eup %736  ;;  %v80_v55 = vadd.f32 1.0, %v735_v50  ;;  %v639_v5 = vmul.f32 -1.442695, %v220_v52  ;;  %v249_v6 = vmul.f32 %v248_v1, %v1006_v0  ;;  %v264_v8 = vstv %s1071_s3  ;;  %s1143_s30 = sld [smem:[#allocation8 + $0x12]]  ;;  %s1150_s1 = sld [smem:[#allocation7 + $0x13]] }
  0x52   :  { %v96_v59 = vadd.f32 1.0, %v737_v54  ;;  %v739_v62 = vpop.eup %738  ;;  %v267_v9 = vstv %s1073_s17  ;;  %v643_v11 = vmul.f32 -1.442695, %v236_v61  ;;  %v265_v13 = vmul.f32 %v264_v8, %v1006_v0  ;;  %s1152_s10 = sld [smem:[#allocation8 + $0x13]]  ;;  %s1161_s12 = sld [smem:[#allocation7 + $0x14]] }
  0x53   :  { %750 = vrcp.f32 %v80_v55  ;;  %v741_v3 = vpop.eup %740  ;;  %v112_v4 = vadd.f32 1.0, %v739_v62  ;;  %v252_v12 = vadd.f32 %v251_v2, %v249_v6  ;;  %v280_v15 = vstv %s1079_s18  ;;  %s1157_s11 = sld [smem:[#allocation10 + $0xb]]  ;;  %s1167_s13 = sld [smem:[#allocation8 + $0x14]] }
  0x54   :  { %752 = vrcp.f32 %v96_v59  ;;  %v128_v7 = vadd.f32 1.0, %v741_v3  ;;  %v283_v16 = vstv %s1081_s19  ;;  %v268_v19 = vadd.f32 %v267_v9, %v265_v13  ;;  %s1169_s14 = sld [smem:[#allocation10 + $0xc]]  ;;  %s1176_s15 = sld [smem:[#allocation7 + $0x15]] }
  0x55   :  { %754 = vpow2.f32 %v635_v57  ;;  %v743_v10 = vpop.eup %742  ;;  %v647_v18 = vmul.f32 -1.442695, %v252_v12  ;;  %v281_v20 = vmul.f32 %v280_v15, %v1006_v0  ;;  %v164_v22 = vstv %s1083_s20  ;;  %s1178_s16 = sld [smem:[#allocation8 + $0x15]]  ;;  %s1186_s3 = sld [smem:[#allocation7 + $0x16]] }
  0x56   :  { %756 = vrcp.f32 %v112_v4  ;;  %v144_v14 = vadd.f32 1.0, %v743_v10  ;;  %v745_v17 = vpop.eup %744  ;;  %v296_v23 = vstv %s1088_s21  ;;  %v651_v25 = vmul.f32 -1.442695, %v268_v19  ;;  %s1182_s0 = sld [smem:[#allocation10 + $0xd]]  ;;  %s1188_s17 = sld [smem:[#allocation8 + $0x16]] }
  0x57   :  { %758 = vrcp.f32 %v128_v7  ;;  %v160_v21 = vadd.f32 1.0, %v745_v17  ;;  %v284_v26 = vadd.f32 %v283_v16, %v281_v20  ;;  %v297_v27 = vmul.f32 %v296_v23, %v1006_v0  ;;  %s1195_s18 = sld [smem:[#allocation10 + $0xe]]  ;;  %s1198_s19 = sld [smem:[#allocation7 + $0x17]] }
  0x58   :  { %760 = vpow2.f32 %v639_v5  ;;  %v747_v24 = vpop.eup %746  ;;  %v180_v29 = vstv %s1092_s22  ;;  %v299_v30 = vstv %s1096_s23  ;;  %v312_v34 = vstv %s1099_s24  ;;  %s1200_s20 = sld [smem:[#allocation10 + $0xf]]  ;;  %s1206_s22 = sld [smem:[#allocation7 + $0x18]] }
  0x59   :  { %762 = vrcp.f32 %v144_v14  ;;  %v176_v28 = vadd.f32 1.0, %v747_v24  ;;  %v655_v32 = vmul.f32 -1.442695, %v284_v26  ;;  %v300_v33 = vadd.f32 %v299_v30, %v297_v27  ;;  %s1204_s21 = sld [smem:[#allocation8 + $0x17]]  ;;  %s1213_s23 = sld [smem:[#allocation8 + $0x18]] }
  0x5a   :  { %764 = vpow2.f32 %v643_v11  ;;  %v749_v31 = vpop.eup %748  ;;  %v313_v37 = vmul.f32 %v312_v34, %v1006_v0  ;;  %v315_v38 = vstv %s1103_s25  ;;  %v196_v42 = vstv %s1105_s26  ;;  %s1216_s24 = sld [smem:[#allocation10 + $0x10]]  ;;  %s1220_s25 = sld [smem:[#allocation7 + $0x19]] }
  0x5b   :  { %766 = vrcp.f32 %v160_v21  ;;  %v192_v36 = vadd.f32 1.0, %v749_v31  ;;  %v659_v43 = vmul.f32 -1.442695, %v300_v33  ;;  %v328_v48 = vstv %s1110_s27  ;;  %s1223_s26 = sld [smem:[#allocation8 + $0x19]] }
  0x5c   :  { %768 = vpow2.f32 %v647_v18  ;;  %v316_v47 = vadd.f32 %v315_v38, %v313_v37  ;;  %v331_v51 = vstv %s1113_s2  ;;  %v212_v58 = vstv %s1117_s28  ;;  %s1226_s27 = sld [smem:[#allocation10 + $0x11]]  ;;  %s1230_s2 = sld [smem:[#allocation7 + $0x1a]] }
  0x5d   :  { %v751_v35 = vpop.eup %750  ;;  %770 = vrcp.f32 %v176_v28  ;;  %v347_v5 = vstv %s1125_s6  ;;  %v228_v8 = vstv %s1127_s7  ;;  %v360_v12 = vstv %s1134_s8  ;;  %s1235_s28 = sld [smem:[#allocation8 + $0x1a]]  ;;  %s1241_s6 = sld [smem:[#allocation8 + $0x1b]] }
  0x5e   :  { %v753_v40 = vpop.eup %752  ;;  %v85_v41 = vmul.f32 %v751_v35, %v84_v39  ;;  %772 = vpow2.f32 %v651_v25  ;;  %v329_v39 = vmul.f32 %v328_v48, %v1006_v0  ;;  %v663_v54 = vmul.f32 -1.442695, %v316_v47  ;;  %s1244_s7 = sld [smem:[#allocation10 + $0x12]]  ;;  %s1247_s8 = sld [smem:[#allocation7 + $0x1c]] }
  0x5f   :  { %v755_v44 = vpop.eup %754  ;;  %v101_v45 = vmul.f32 %v753_v40, %v100_v46  ;;  %774 = vrcp.f32 %v192_v36  ;;  %v361_v16 = vmul.f32 %v360_v12, %v1006_v0  ;;  %v244_v19 = vstv %s1139_s9  ;;  %s1249_s9 = sld [smem:[#allocation8 + $0x1c]] }
  0x60   :  { %v757_v49 = vpop.eup %756  ;;  %v208_v50 = vadd.f32 1.0, %v755_v44  ;;  %776 = vpow2.f32 %v655_v32  ;;  %v332_v59 = vadd.f32 %v331_v51, %v329_v39  ;;  %v363_v21 = vstv %s1143_s30  ;;  %s1251_s30 = sld [smem:[#allocation10 + $0x13]] }
  0x61   :  { %v759_v52 = vpop.eup %758  ;;  %v102_v53 = vadd.f32 %v101_v45, %v85_v41  ;;  %v117_v46 = vmul.f32 %v757_v49, %v116_v56  ;;  %778 = vpow2.f32 %v659_v43  ;;  %v344_v56 = vstv %s1122_s29  ;;  %s1239_s29 = sld [smem:[#allocation7 + $0x1b]] }
  0x62   :  { %v761_v55 = vpop.eup %760  ;;  %v133_v57 = vmul.f32 %v759_v52, %v132_v60  ;;  %780 = vrcp.f32 %v208_v50  ;;  %v667_v60 = vmul.f32 -1.442695, %v332_v59  ;;  %v345_v4 = vmul.f32 %v344_v56, %v1006_v0 }
  0x63   :  { %v763_v61 = vpop.eup %762  ;;  %v118_v62 = vadd.f32 %v117_v46, %v102_v53  ;;  %v224_v1 = vadd.f32 1.0, %v761_v55  ;;  %782 = vpow2.f32 %v663_v54  ;;  %v364_v25 = vadd.f32 %v363_v21, %v361_v16 }
  0x64   :  { %v765_v2 = vpop.eup %764  ;;  %v149_v3 = vmul.f32 %v763_v61, %v148_v63  ;;  %v348_v63 = vadd.f32 %v347_v5, %v345_v4  ;;  %v376_v28 = vstv %s1150_s1  ;;  %v260_v35 = vstv %s1157_s11  ;;  %s1255_s1 = sld [smem:[#allocation7 + $0x1d]]  ;;  %s1261_s11 = sld [smem:[#allocation10 + $0x14]] }
  0x65   :  { %v767_v6 = vpop.eup %766  ;;  %v134_v7 = vadd.f32 %v133_v57, %v118_v62  ;;  %784 = vrcp.f32 %v224_v1  ;;  %v240_v9 = vadd.f32 1.0, %v765_v2  ;;  %v675_v33 = vmul.f32 -1.442695, %v364_v25 }
  0x66   :  { %v769_v10 = vpop.eup %768  ;;  %v165_v11 = vmul.f32 %v767_v6, %v164_v22  ;;  %786 = vpow2.f32 %v667_v60  ;;  %v671_v20 = vmul.f32 -1.442695, %v348_v63  ;;  %v377_v37 = vmul.f32 %v376_v28, %v1006_v0 }
  0x67   :  { %v771_v13 = vpop.eup %770  ;;  %v150_v14 = vadd.f32 %v149_v3, %v134_v7  ;;  %788 = vrcp.f32 %v240_v9  ;;  %v256_v15 = vadd.f32 1.0, %v769_v10  ;;  %v392_v38 = vstv %s1161_s12  ;;  %s1265_s12 = sld [smem:[#allocation7 + $0x1e]] }
  0x68   :  { %v773_v17 = vpop.eup %772  ;;  %v181_v18 = vmul.f32 %v771_v13, %v180_v29  ;;  %v379_v29 = vstv %s1152_s10  ;;  %v393_v43 = vmul.f32 %v392_v38, %v1006_v0  ;;  %v395_v47 = vstv %s1167_s13  ;;  %s1258_s10 = sld [smem:[#allocation8 + $0x1d]] }
  0x69   :  { %v775_v22 = vpop.eup %774  ;;  %v166_v23 = vadd.f32 %v165_v11, %v150_v14  ;;  %790 = vrcp.f32 %v256_v15  ;;  %v272_v24 = vadd.f32 1.0, %v773_v17  ;;  %v380_v45 = vadd.f32 %v379_v29, %v377_v37  ;;  %s1267_s13 = sld [smem:[#allocation10 + $0x15]] }
  0x6a   :  { %v777_v26 = vpop.eup %776  ;;  %v197_v27 = vmul.f32 %v775_v22, %v196_v42  ;;  %792 = vpow2.f32 %v671_v20  ;;  %v276_v50 = vstv %s1169_s14  ;;  %v396_v39 = vadd.f32 %v395_v47, %v393_v43  ;;  %s1271_s14 = sld [smem:[#allocation8 + $0x1e]] }
  0x6b   :  { %v779_v30 = vpop.eup %778  ;;  %v182_v31 = vadd.f32 %v181_v18, %v166_v23  ;;  %794 = vrcp.f32 %v272_v24  ;;  %v288_v32 = vadd.f32 1.0, %v777_v26  ;;  %v679_v53 = vmul.f32 -1.442695, %v380_v45 }
  0x6c   :  { %v781_v34 = vpop.eup %780  ;;  %v304_v36 = vadd.f32 1.0, %v779_v30  ;;  %v408_v46 = vstv %s1176_s15  ;;  %v683_v57 = vmul.f32 -1.442695, %v396_v39  ;;  %v411_v59 = vstv %s1178_s16  ;;  %s1275_s15 = sld [smem:[#allocation7 + $0x1f]] }
  0x6d   :  { %v783_v40 = vpop.eup %782  ;;  %v198_v41 = vadd.f32 %v197_v27, %v182_v31  ;;  %v213_v42 = vmul.f32 %v781_v34, %v212_v58  ;;  %796 = vrcp.f32 %v288_v32  ;;  %v409_v58 = vmul.f32 %v408_v46, %v1006_v0  ;;  %s1281_s16 = sld [smem:[#allocation8 + $0x1f]] }
  0x6e   :  { %798 = vrcp.f32 %v304_v36  ;;  %v320_v44 = vadd.f32 1.0, %v783_v40  ;;  %v292_v1 = vstv %s1182_s0  ;;  %v424_v3 = vstv %s1186_s3  ;;  %s1287_s0 = sld [smem:[#allocation10 + $0x16]]  ;;  %s1293_s3 = sld [smem:[#allocation10 + $0x17]] }
  0x6f   :  { %v785_v48 = vpop.eup %784  ;;  %v214_v49 = vadd.f32 %v213_v42, %v198_v41  ;;  %800 = vpow2.f32 %v675_v33  ;;  %v412_v2 = vadd.f32 %v411_v59, %v409_v58  ;;  %v427_v60 = vstv %s1188_s17  ;;  %s1298_s17 = sld [smem:[#allocation10 + $0x18]] }
  0x70   :  { %v787_v51 = vpop.eup %786  ;;  %v229_v52 = vmul.f32 %v785_v48, %v228_v8  ;;  %802 = vrcp.f32 %v320_v44  ;;  %v425_v7 = vmul.f32 %v424_v3, %v1006_v0  ;;  %v308_v9 = vstv %s1195_s18  ;;  %s1301_s18 = sld [smem:[#allocation10 + $0x19]] }
  0x71   :  { %v789_v54 = vpop.eup %788  ;;  %v336_v55 = vadd.f32 1.0, %v787_v51  ;;  %804 = vpow2.f32 %v679_v53  ;;  %v687_v11 = vmul.f32 -1.442695, %v412_v2  ;;  %v440_v63 = vstv %s1198_s19  ;;  %s1304_s19 = sld [smem:[#allocation10 + $0x1a]] }
  0x72   :  { %v230_v61 = vadd.f32 %v229_v52, %v214_v49  ;;  %v245_v62 = vmul.f32 %v789_v54, %v244_v19  ;;  %v428_v14 = vadd.f32 %v427_v60, %v425_v7  ;;  %v441_v15 = vmul.f32 %v440_v63, %v1006_v0 }
  0x73   :  { %v791_v56 = vpop.eup %790  ;;  %806 = vrcp.f32 %v336_v55  ;;  %v324_v17 = vstv %s1200_s20  ;;  %v443_v18 = vstv %s1204_s21  ;;  %v456_v19 = vstv %s1206_s22  ;;  %s712_s20 = sld [smem:[#allocation10 + $0x1b]]  ;;  %s716_s21 = sld [smem:[#allocation10 + $0x1c]] }
  0x74   :  { %v793_v4 = vpop.eup %792  ;;  %v246_v5 = vadd.f32 %v245_v62, %v230_v61  ;;  %v261_v6 = vmul.f32 %v791_v56, %v260_v35  ;;  %808 = vpow2.f32 %v683_v57  ;;  %v691_v23 = vmul.f32 -1.442695, %v428_v14  ;;  %s720_s22 = sld [smem:[#allocation10 + $0x1d]] }
  0x75   :  { %v795_v8 = vpop.eup %794  ;;  %v352_v10 = vadd.f32 1.0, %v793_v4  ;;  %v444_v26 = vadd.f32 %v443_v18, %v441_v15  ;;  %v457_v27 = vmul.f32 %v456_v19, %v1006_v0  ;;  %v459_v28 = vstv %s1213_s23  ;;  %s724_s23 = sld [smem:[#allocation10 + $0x1e]] }
  0x76   :  { %v262_v12 = vadd.f32 %v261_v6, %v246_v5  ;;  %v277_v13 = vmul.f32 %v795_v8, %v276_v50  ;;  %v340_v31 = vstv %s1216_s24  ;;  %v472_v36 = vstv %s1220_s25  ;;  %s728_s24 = sld [smem:[#allocation10 + $0x1f]] }
  0x77   :  { %v797_v16 = vpop.eup %796  ;;  %810 = vrcp.f32 %v352_v10  ;;  %v695_v34 = vmul.f32 -1.442695, %v444_v26  ;;  %v460_v35 = vadd.f32 %v459_v28, %v457_v27  ;;  %v473_v40 = vmul.f32 %v472_v36, %v1006_v0 }
  0x78   :  { %v799_v20 = vpop.eup %798  ;;  %v278_v21 = vadd.f32 %v277_v13, %v262_v12  ;;  %v293_v22 = vmul.f32 %v797_v16, %v292_v1  ;;  %812 = vpow2.f32 %v687_v11  ;;  %v475_v41 = vstv %s1223_s26 }
  0x79   :  { %v801_v24 = vpop.eup %800  ;;  %v309_v25 = vmul.f32 %v799_v20, %v308_v9  ;;  %814 = vpow2.f32 %v691_v23  ;;  %v356_v43 = vstv %s1226_s27  ;;  %v699_v45 = vmul.f32 -1.442695, %v460_v35  ;;  %s954_s27 = smov [#allocation11]  }
  0x7a   :  { %v803_v29 = vpop.eup %802  ;;  %v294_v30 = vadd.f32 %v293_v22, %v278_v21  ;;  %v368_v32 = vadd.f32 1.0, %v801_v24  ;;  %v476_v50 = vadd.f32 %v475_v41, %v473_v40  ;;  %v488_v39 = vstv %s1230_s2  ;;  %s593_s2 = sshll.u32 %s954_s27, 4  ;;  %s594_s2 = int_to_ptr.vmem [resolvable:$true] %s593_s2 }
  0x7b   :  { %v325_v33 = vmul.f32 %v803_v29, %v324_v17  ;;  %v805_v37 = vpop.eup %804  ;;  %v489_v52 = vmul.f32 %v488_v39, %v1006_v0  ;;  %v491_v53 = vstv %s1235_s28  ;;  %v504_v58 = vstv %s1239_s29  ;;  %s920_s28 = scalar_lea.vmem %s594_s2, 64  ;;  %p925_p10 = scmp.lt.s32.totalorder %s594_s2, %s594_s2 }
  0x7c   :  { %v310_v38 = vadd.f32 %v309_v25, %v294_v30  ;;  %816 = vrcp.f32 %v368_v32  ;;  %v384_v44 = vadd.f32 1.0, %v805_v37  ;;  %v703_v54 = vmul.f32 -1.442695, %v476_v50  ;;  %p921_p9 = scmp.ne.s32.totalorder %s594_s2, %s920_s28  ;;  %p926_p11 = scmp.lt.s32.totalorder %s920_s28, %s920_s28 }
  0x7d   :  { %v807_v42 = vpop.eup %806  ;;  %818 = vpow2.f32 %v695_v34  ;;  %v492_v57 = vadd.f32 %v491_v53, %v489_v52  ;;  %v507_v59 = vstv %s1241_s6  ;;  %v372_v1 = vstv %s1244_s7 }
  0x7e   :  { %v809_v47 = vpop.eup %808  ;;  %v326_v48 = vadd.f32 %v325_v33, %v310_v38  ;;  %v341_v49 = vmul.f32 %v807_v42, %v340_v31  ;;  %820 = vrcp.f32 %v384_v44  ;;  %v505_v56 = vmul.f32 %v504_v58, %v1006_v0  ;;  %p927_p12 = por %p926_p11, %p925_p10 }
  0x7f   :  { %v400_v51 = vadd.f32 1.0, %v809_v47  ;;  %822 = vpow2.f32 %v699_v45  ;;  %v707_v3 = vmul.f32 -1.442695, %v492_v57  ;;  %v520_v60 = vstv %s1247_s8 }
  0x80   :  { %v342_v46 = vadd.f32 %v341_v49, %v326_v48  ;;  %v523_v4 = vstv %s1249_s9  ;;  %v388_v7 = vstv %s1251_s30  ;;  %v508_v8 = vadd.f32 %v507_v59, %v505_v56  ;;  %p928_p13 = pnand %p927_p12, %p921_p9 }
  0x81   :  { %v811_v55 = vpop.eup %810  ;;  %824 = vrcp.f32 %v400_v51  ;;  %v521_v9 = vmul.f32 %v520_v60, %v1006_v0  ;;  %v536_v11 = vstv %s1255_s1  ;;  %v539_v63 = vstv %s1258_s10 }
  0x82   :  { %v813_v61 = vpop.eup %812  ;;  %v357_v62 = vmul.f32 %v811_v55, %v356_v43  ;;  %826 = vpow2.f32 %v703_v54  ;;  %v711_v13 = vmul.f32 -1.442695, %v508_v8  ;;  %v537_v15 = vmul.f32 %v536_v11, %v1006_v0 }
  0x83   :  { %v416_v2 = vadd.f32 1.0, %v813_v61  ;;  %v815_v5 = vpop.eup %814  ;;  %v524_v14 = vadd.f32 %v523_v4, %v521_v9  ;;  %v404_v18 = vstv %s1261_s11  ;;  %v552_v19 = vstv %s1265_s12 }
  0x84   :  { %v358_v6 = vadd.f32 %v357_v62, %v342_v46  ;;  %v432_v10 = vadd.f32 1.0, %v815_v5  ;;  %v540_v22 = vadd.f32 %v539_v63, %v537_v15  ;;  %v420_v25 = vstv %s1267_s13 }
  0x85   :  { %828 = vrcp.f32 %v416_v2  ;;  %v715_v21 = vmul.f32 -1.442695, %v524_v14  ;;  %v553_v26 = vmul.f32 %v552_v19, %v1006_v0  ;;  %v555_v27 = vstv %s1271_s14 }
  0x86   :  { %v817_v12 = vpop.eup %816  ;;  %830 = vpow2.f32 %v707_v3  ;;  %v719_v30 = vmul.f32 -1.442695, %v540_v22  ;;  %v568_v31 = vstv %s1275_s15  ;;  %v571_v40 = vstv %s1281_s16 }
  0x87   :  { %v819_v16 = vpop.eup %818  ;;  %v373_v17 = vmul.f32 %v817_v12, %v372_v1  ;;  %832 = vrcp.f32 %v432_v10  ;;  %v556_v34 = vadd.f32 %v555_v27, %v553_v26  ;;  %v569_v35 = vmul.f32 %v568_v31, %v1006_v0 }
  0x88   :  { %v448_v20 = vadd.f32 1.0, %v819_v16  ;;  %834 = vpow2.f32 %v711_v13  ;;  %v821_v23 = vpop.eup %820  ;;  %v436_v47 = vstv %s1287_s0  ;;  %v452_v46 = vstv %s1293_s3 }
  0x89   :  { %v374_v24 = vadd.f32 %v373_v17, %v358_v6  ;;  %v823_v28 = vpop.eup %822  ;;  %v389_v29 = vmul.f32 %v821_v23, %v388_v7  ;;  %v723_v42 = vmul.f32 -1.442695, %v556_v34  ;;  %v572_v43 = vadd.f32 %v571_v40, %v569_v35 }
  0x8a   :  { %836 = vrcp.f32 %v448_v20  ;;  %v464_v33 = vadd.f32 1.0, %v823_v28  ;;  %v468_v61 = vstv %s1298_s17  ;;  %v484_v3 = vstv %s1301_s18 }
  0x8b   :  { %v825_v32 = vpop.eup %824  ;;  %838 = vpow2.f32 %v715_v21  ;;  %v390_v37 = vadd.f32 %v389_v29, %v374_v24  ;;  %v727_v48 = vmul.f32 -1.442695, %v572_v43  ;;  %v500_v10 = vstv %s1304_s19 }
  0x8c   :  { %v827_v36 = vpop.eup %826  ;;  %v405_v38 = vmul.f32 %v825_v32, %v404_v18  ;;  %840 = vpow2.f32 %v719_v30  ;;  %v516_v14 = vstv %s712_s20  ;;  %v532_v19 = vstv %s716_s21 }
  0x8d   :  { %842 = vrcp.f32 %v464_v33  ;;  %v480_v41 = vadd.f32 1.0, %v827_v36  ;;  %v548_v20 = vstv %s720_s22  ;;  %v564_v27 = vstv %s724_s23 }
  0x8e   :  { %v406_v44 = vadd.f32 %v405_v38, %v390_v37  ;;  %v580_v28 = vstv %s728_s24  ;;  %v584_v35 = vstv %s1328_s4 }
  0x8f   :  { %v829_v45 = vpop.eup %828  ;;  %844 = vrcp.f32 %v480_v41 }
  0x90   :  { %v831_v0 = vpop.eup %830  ;;  %v421_v49 = vmul.f32 %v829_v45, %v420_v25  ;;  %846 = vpow2.f32 %v723_v42 }
  0x91   :  { %v833_v50 = vpop.eup %832  ;;  %v496_v39 = vadd.f32 1.0, %v831_v0  ;;  %848 = vpow2.f32 %v727_v48 }
  0x92   :  { %v835_v51 = vpop.eup %834  ;;  %v422_v52 = vadd.f32 %v421_v49, %v406_v44  ;;  %v437_v53 = vmul.f32 %v833_v50, %v436_v47 }
  0x93   :  { %850 = vrcp.f32 %v496_v39  ;;  %v512_v54 = vadd.f32 1.0, %v835_v51 }
  0x94   :  { %v837_v55 = vpop.eup %836  ;;  %v438_v57 = vadd.f32 %v437_v53, %v422_v52 }
  0x95   :  { %v839_v58 = vpop.eup %838  ;;  %v453_v59 = vmul.f32 %v837_v55, %v452_v46  ;;  %852 = vrcp.f32 %v512_v54 }
  0x96   :  { %v841_v62 = vpop.eup %840  ;;  %v528_v1 = vadd.f32 1.0, %v839_v58 }
  0x97   :  { %v843_v56 = vpop.eup %842  ;;  %v454_v2 = vadd.f32 %v453_v59, %v438_v57  ;;  %v544_v60 = vadd.f32 1.0, %v841_v62 }
  0x98   :  { %v469_v4 = vmul.f32 %v843_v56, %v468_v61  ;;  %854 = vrcp.f32 %v528_v1 }
  0x99   :  { %v845_v5 = vpop.eup %844  ;;  %856 = vrcp.f32 %v544_v60 }
  0x9a   :  { %v847_v6 = vpop.eup %846  ;;  %v470_v7 = vadd.f32 %v469_v4, %v454_v2  ;;  %v485_v8 = vmul.f32 %v845_v5, %v484_v3 }
  0x9b   :  { %v849_v9 = vpop.eup %848  ;;  %v560_v11 = vadd.f32 1.0, %v847_v6 }
  0x9c   :  { %v486_v63 = vadd.f32 %v485_v8, %v470_v7  ;;  %v576_v12 = vadd.f32 1.0, %v849_v9 }
  0x9d   :  { %v851_v13 = vpop.eup %850  ;;  %858 = vrcp.f32 %v560_v11 }
  0x9e   :  { %v501_v15 = vmul.f32 %v851_v13, %v500_v10  ;;  %860 = vrcp.f32 %v576_v12 }
  0x9f   :  { %v853_v16 = vpop.eup %852 }
  0xa0   :  { %v502_v17 = vadd.f32 %v501_v15, %v486_v63  ;;  %v517_v18 = vmul.f32 %v853_v16, %v516_v14 }
  0xa2   :  { %v855_v21 = vpop.eup %854  ;;  %v518_v22 = vadd.f32 %v517_v18, %v502_v17 }
  0xa3   :  { %v857_v23 = vpop.eup %856  ;;  %v533_v24 = vmul.f32 %v855_v21, %v532_v19 }
  0xa4   :  { %v549_v25 = vmul.f32 %v857_v23, %v548_v20 }
  0xa5   :  { %v534_v26 = vadd.f32 %v533_v24, %v518_v22 }
  0xa7   :  { %v859_v29 = vpop.eup %858  ;;  %v550_v30 = vadd.f32 %v549_v25, %v534_v26 }
  0xa8   :  { %v861_v31 = vpop.eup %860  ;;  %v565_v32 = vmul.f32 %v859_v29, %v564_v27 }
  0xa9   :  { %v581_v33 = vmul.f32 %v861_v31, %v580_v28 }
  0xaa   :  { %v566_v34 = vadd.f32 %v565_v32, %v550_v30 }
  0xac   :  { %v582_v36 = vadd.f32 %v581_v33, %v566_v34 }
  0xae   :  { %v585_v37 = vadd.f32 %v584_v35, %v582_v36 }
  0xb0   :  { %586 = vst [vmem:[#allocation11] sm:$0x7] %v585_v37 }
  0xb1   :  { %931 = shalt.err (!%p928_p13)
}
  0xb2   :  { %s932_s7 = scalar_lea.hbm %s1329_s5, 64 }
  0xb3   :  { %p933_p0 = scmp.ne.s32.totalorder %s1329_s5, %s932_s7  ;;  %p936_p1 = scmp.lt.u32.totalorder %s932_s7, %s1329_s5 }
  0xb5   :  { %p938_p2 = pnand %p936_p1, %p933_p0 }
  0xb7   :  { %941 = shalt.err (!%p938_p2)
}
  0xb8   :  { %596 = dma.vmem_to_hbm [thread:$0]  %s594_s2, 64, %s1329_s5, [#allocation5]  }
  0xb9   :  { %948 = dma.done.wait [#allocation5], 64  }
  0xba   :  { %949 = vsyncadd [#allocation5], 4294967232 }
  0xbb   :  { %600 = vsyncpa [#allocation4], 1 }
  0xbc   :  { %601 = vsyncpa [#allocation5], 1 }
  0xbd   :  { %602 = vsyncpa [#allocation6], 1 }
  0xbe   :  { %603 = vsyncpa [#allocation9], 1 }

</bundles_post_ra>
